<compile_context>
chip_gen: v7x
topology: tpu7x:2x2x1
jax: 0.10.0
libtpu: 0.0.40
codegen_flags: <defaults>
</compile_context>

<pallas_src>
import jax
import jax.numpy as jnp
from jax import lax
from jax.experimental import pallas as pl
from jax.experimental.pallas import tpu as pltpu

EPS = 1e-5
LANES = 128


def _transition_kernel(x_ref, mb_ref, w_ref, b_ref, o_ref):
    # x tile: (tm, P) where P = pack * dz; each row holds `pack` logical feature
    # vectors side by side (lane-dense packing of the channel dim).
    x = x_ref[...].astype(jnp.float32)

    # Per-group (per logical dz-vector) LayerNorm via block-diagonal averaging
    # matrix mb[i, j] = 1/dz if i, j in same group else 0 (MXU, huge slack here).
    mb = mb_ref[...]
    mean = jnp.dot(x, mb, preferred_element_type=jnp.float32)
    xc = x - mean
    var = jnp.dot(xc * xc, mb, preferred_element_type=jnp.float32)
    scaled = xc * lax.rsqrt(var + EPS)

    # Folded transition (gamma folded into W, beta/b1/b2 folded into bias).
    y = jnp.dot(scaled, w_ref[...], preferred_element_type=jnp.float32) + b_ref[...]

    o_ref[...] = y.astype(o_ref.dtype)


def _pack_factor(dz):
    if dz <= LANES and LANES % dz == 0:
        return LANES // dz
    return 1  # lane-sparse fallback only for exotic dz (not hit by this module)


def prepare_transition_params(gamma, beta, w1, b1, w2, b2):
    """One-time parameter preparation (hoisted out of the per-call path).

    Weights are stored as (in_features, out_features), i.e. transposed vs.
    PyTorch's nn.Linear (out, in) layout, so y = x @ W + b directly.
    Folding is exact because the module has no activation between the Linears.
    """
    f32 = jnp.float32
    dz = gamma.shape[0]
    pack = _pack_factor(dz)
    p_dim = pack * dz

    w_fold = jnp.dot(w1.astype(f32), w2.astype(f32), preferred_element_type=f32)      # (dz, dz)
    b_fold = jnp.dot(b1.astype(f32), w2.astype(f32), preferred_element_type=f32) \
        + b2.astype(f32)                                                               # (dz,)
    # Fold LayerNorm affine: y = (xc*inv) @ (diag(gamma) Wf) + (beta @ Wf + bf)
    w_scaled = gamma.astype(f32)[:, None] * w_fold                                     # (dz, dz)
    b_comb = jnp.dot(beta.astype(f32), w_fold, preferred_element_type=f32) + b_fold    # (dz,)

    eye = jnp.eye(pack, dtype=f32)
    mb = jnp.kron(eye, jnp.full((dz, dz), 1.0 / dz, dtype=f32))                        # (P, P)
    w_p = jnp.kron(eye, w_scaled)                                                      # (P, P)
    b_p = jnp.tile(b_comb, pack).reshape(1, p_dim)                                     # (1, P)

    return {"dz": dz, "pack": pack, "mb": mb, "w": w_p, "b": b_p}


def transition_apply(z_com, params, *, tm=4096):
    dz = params["dz"]
    pack = int(params["pack"])
    p_dim = pack * dz
    assert z_com.shape[-1] == dz

    lead_shape = z_com.shape[:-1]
    m = 1
    for s in lead_shape:
        m *= s

    x = z_com.reshape(m, dz)
    # Pad rows to a multiple of `pack` so the lane-dense packed view always applies
    # (no lane-sparse fallback). Zero rows give rsqrt(eps): finite, and sliced off.
    pad = (-m) % pack
    if pad:
        x = jnp.concatenate([x, jnp.zeros((pad, dz), dtype=x.dtype)], axis=0)
    m_pad = m + pad
    m_rows = m_pad // pack
    x = x.reshape(m_rows, p_dim)  # metadata-only reshape (row-major contiguous)

    # Row tile: as large as possible (HBM-streaming bound on every generation).
    tm_eff = min(tm, m_rows)
    if tm_eff < m_rows:
        tm_eff = max(8, (tm_eff // 8) * 8)  # (8,128) block rule when not full-extent
    grid_len = pl.cdiv(m_rows, tm_eff)

    # Explicit VMEM budget: 2 in + 2 out buffers + ~6 tile-sized f32 temps + consts.
    tile_bytes = tm_eff * p_dim * 4
    const_bytes = 2 * p_dim * p_dim * 4 + p_dim * 4
    vmem_bytes = 10 * tile_bytes + 2 * const_bytes + (2 << 20)
    vmem_bytes = int(min(max(vmem_bytes, 32 << 20), 48 << 20))  # safe on v5e/v6e/v7x

    def const_spec(shape):
        # Constant index map: block never changes, single-buffer it (saves VMEM/DMA).
        return pl.BlockSpec(shape, lambda i: (0, 0), pipeline_mode=pl.Buffered(1))

    out = pl.pallas_call(
        _transition_kernel,
        out_shape=jax.ShapeDtypeStruct((m_rows, p_dim), z_com.dtype),
        grid_spec=pltpu.PrefetchScalarGridSpec(
            num_scalar_prefetch=0,
            grid=(grid_len,),
            in_specs=[
                pl.BlockSpec((tm_eff, p_dim), lambda i: (i, 0)),  # x tile (lane-dense)
                const_spec((p_dim, p_dim)),                        # block-diag mean matrix
                const_spec((p_dim, p_dim)),                        # block-diag folded W (gamma-scaled)
                const_spec((1, p_dim)),                            # combined bias
            ],
            out_specs=pl.BlockSpec((tm_eff, p_dim), lambda i: (i, 0)),
        ),
        compiler_params=pltpu.CompilerParams(
            dimension_semantics=("parallel",),
            vmem_limit_bytes=vmem_bytes,
        ),
    )(x, params["mb"], params["w"], params["b"])

    out = out.reshape(m_pad, dz)
    if pad:
        out = out[:m]
    return out.reshape(*lead_shape, dz)


def transition_forward(z_com, gamma, beta, w1, b1, w2, b2, *, tm=4096):
    """Convenience one-shot wrapper (prefer prepare_transition_params + transition_apply
    when the same parameters are reused across calls)."""
    params = prepare_transition_params(gamma, beta, w1, b1, w2, b2)
    return transition_apply(z_com, params, tm=tm)


def reference_forward(z_com, gamma, beta, w1, b1, w2, b2):
    # Un-folded reference matching the PyTorch module's forward exactly.
    x = z_com.astype(jnp.float32)
    mean = jnp.mean(x, axis=-1, keepdims=True)
    var = jnp.mean((x - mean) ** 2, axis=-1, keepdims=True)
    xn = (x - mean) * lax.rsqrt(var + EPS) * gamma + beta
    h = xn @ w1 + b1
    y = h @ w2 + b2
    return y.astype(z_com.dtype)


if __name__ == "__main__":
    # Small shapes consistent with the module: channel_z=32, transition_n=4.
    channel_z = 32
    transition_n = 4
    hidden = channel_z * transition_n

    key = jax.random.PRNGKey(0)
    k_x, k_g, k_b, k_w1, k_b1, k_w2, k_b2, k_x2 = jax.random.split(key, 8)

    # Synthetic parameters (shapes per nn.LayerNorm / nn.Linear, stored (in, out)).
    gamma = 1.0 + 0.1 * jax.random.normal(k_g, (channel_z,), dtype=jnp.float32)
    beta = 0.1 * jax.random.normal(k_b, (channel_z,), dtype=jnp.float32)
    w1 = jax.random.normal(k_w1, (channel_z, hidden), dtype=jnp.float32) / jnp.sqrt(channel_z)
    b1 = 0.01 * jax.random.normal(k_b1, (hidden,), dtype=jnp.float32)
    w2 = jax.random.normal(k_w2, (hidden, channel_z), dtype=jnp.float32) / jnp.sqrt(hidden)
    b2 = 0.01 * jax.random.normal(k_b2, (channel_z,), dtype=jnp.float32)

    params = prepare_transition_params(gamma, beta, w1, b1, w2, b2)

    # Case 1: pair-representation shaped input, rows divisible by pack.
    B, L = 2, 8  # z_com: [B, L, L, dz]
    z_com = jax.random.normal(k_x, (B, L, L, channel_z), dtype=jnp.float32)
    out = jax.block_until_ready(transition_apply(z_com, params))
    ref = reference_forward(z_com, gamma, beta, w1, b1, w2, b2)
    assert out.shape == z_com.shape
    assert jnp.allclose(out, ref, atol=1e-3, rtol=1e-3), "mismatch vs reference (case 1)"

    # Case 2: ragged row count (exercises the padding path that replaces the
    # lane-sparse pack=1 fallback).
    L2 = 5
    z_com2 = jax.random.normal(k_x2, (B, L2, L2, channel_z), dtype=jnp.float32)
    out2 = jax.block_until_ready(transition_apply(z_com2, params))
    ref2 = reference_forward(z_com2, gamma, beta, w1, b1, w2, b2)
    assert out2.shape == z_com2.shape
    assert jnp.allclose(out2, ref2, atol=1e-3, rtol=1e-3), "mismatch vs reference (case 2)"

    print("KERNEL_OK")
</pallas_src>

<mosaic_0001>
module attributes {stable_mosaic.version = 11 : i64} {
  func.func @_transition_kernel(%arg0: i32, %arg1: memref<32x128xf32, #tpu.memory_space<vmem>>, %arg2: memref<128x128xf32, #tpu.memory_space<vmem>>, %arg3: memref<128x128xf32, #tpu.memory_space<vmem>>, %arg4: memref<1x128xf32, #tpu.memory_space<vmem>>, %arg5: memref<32x128xf32, #tpu.memory_space<vmem>>) attributes {dimension_semantics = [#tpu.dimension_semantics<parallel>], iteration_bounds = array<i64: 1>, scalar_prefetch = 0 : i64, scratch_operands = 0 : i64, tpu.core_type = #tpu.core_type<tc>, window_params = [{transform_indices = @transform_0, window_bounds = array<i64: 32, 128>}, {pipeline_mode = #tpu.pipeline_mode<synchronous>, transform_indices = @transform_1, window_bounds = array<i64: 128, 128>}, {pipeline_mode = #tpu.pipeline_mode<synchronous>, transform_indices = @transform_2, window_bounds = array<i64: 128, 128>}, {pipeline_mode = #tpu.pipeline_mode<synchronous>, transform_indices = @transform_3, window_bounds = array<i64: 1, 128>}, {transform_indices = @transform_4, window_bounds = array<i64: 32, 128>}]} {
    %c0 = arith.constant 0 : index
    %c0_0 = arith.constant 0 : index
    %0 = vector.load %arg1[%c0, %c0_0] : memref<32x128xf32, #tpu.memory_space<vmem>>, vector<32x128xf32>
    %c0_1 = arith.constant 0 : index
    %c0_2 = arith.constant 0 : index
    %1 = vector.load %arg2[%c0_1, %c0_2] : memref<128x128xf32, #tpu.memory_space<vmem>>, vector<128x128xf32>
    %cst = arith.constant dense<0.000000e+00> : vector<32x128xf32>
    %2 = tpu.matmul %0, %1, %cst {dimension_numbers = #tpu.dot_dimension_numbers<[1], [0], [0], [1], [0, 0, 1, 1], [], []>} : vector<32x128xf32>, vector<128x128xf32>, vector<32x128xf32> -> vector<32x128xf32>
    %3 = arith.subf %0, %2 : vector<32x128xf32>
    %4 = arith.mulf %3, %3 : vector<32x128xf32>
    %cst_3 = arith.constant dense<0.000000e+00> : vector<32x128xf32>
    %5 = tpu.matmul %4, %1, %cst_3 {dimension_numbers = #tpu.dot_dimension_numbers<[1], [0], [0], [1], [0, 0, 1, 1], [], []>} : vector<32x128xf32>, vector<128x128xf32>, vector<32x128xf32> -> vector<32x128xf32>
    %cst_4 = arith.constant 9.99999974E-6 : f32
    %6 = vector.broadcast %cst_4 : f32 to vector<32x128xf32>
    %7 = arith.addf %5, %6 : vector<32x128xf32>
    %8 = math.rsqrt %7 : vector<32x128xf32>
    %9 = arith.mulf %3, %8 : vector<32x128xf32>
    %c0_5 = arith.constant 0 : index
    %c0_6 = arith.constant 0 : index
    %10 = vector.load %arg3[%c0_5, %c0_6] : memref<128x128xf32, #tpu.memory_space<vmem>>, vector<128x128xf32>
    %cst_7 = arith.constant dense<0.000000e+00> : vector<32x128xf32>
    %11 = tpu.matmul %9, %10, %cst_7 {dimension_numbers = #tpu.dot_dimension_numbers<[1], [0], [0], [1], [0, 0, 1, 1], [], []>} : vector<32x128xf32>, vector<128x128xf32>, vector<32x128xf32> -> vector<32x128xf32>
    %c0_8 = arith.constant 0 : index
    %c0_9 = arith.constant 0 : index
    %12 = vector.load %arg4[%c0_8, %c0_9] : memref<1x128xf32, #tpu.memory_space<vmem>>, vector<1x128xf32>
    %13 = vector.broadcast %12 : vector<1x128xf32> to vector<32x128xf32>
    %14 = arith.addf %11, %13 : vector<32x128xf32>
    %c0_10 = arith.constant 0 : index
    %c0_11 = arith.constant 0 : index
    %15 = vector.load %arg5[%c0_10, %c0_11] : memref<32x128xf32, #tpu.memory_space<vmem>>, vector<32x128xf32>
    tpu.vector_store %arg5[%c0_10, %c0_11], %14 {strides = array<i32>} : memref<32x128xf32, #tpu.memory_space<vmem>>, vector<32x128xf32>,
    return
  }
  func.func @transform_0(%arg0: i32) -> (i32, i32) {
    %c0_i32 = arith.constant 0 : i32
    %c0_i32_0 = arith.constant 0 : i32
    return %arg0, %c0_i32 : i32, i32
  }
  func.func @transform_1(%arg0: i32) -> (i32, i32) {
    %c0_i32 = arith.constant 0 : i32
    %c0_i32_0 = arith.constant 0 : i32
    %c0_i32_1 = arith.constant 0 : i32
    return %c0_i32, %c0_i32_0 : i32, i32
  }
  func.func @transform_2(%arg0: i32) -> (i32, i32) {
    %c0_i32 = arith.constant 0 : i32
    %c0_i32_0 = arith.constant 0 : i32
    %c0_i32_1 = arith.constant 0 : i32
    return %c0_i32, %c0_i32_0 : i32, i32
  }
  func.func @transform_3(%arg0: i32) -> (i32, i32) {
    %c0_i32 = arith.constant 0 : i32
    %c0_i32_0 = arith.constant 0 : i32
    %c0_i32_1 = arith.constant 0 : i32
    return %c0_i32, %c0_i32_0 : i32, i32
  }
  func.func @transform_4(%arg0: i32) -> (i32, i32) {
    %c0_i32 = arith.constant 0 : i32
    %c0_i32_0 = arith.constant 0 : i32
    return %arg0, %c0_i32 : i32, i32
  }
}

</mosaic_0001>

<bundles_post_ra>
// kernel: tpu_custom_call.1
= control target key start
LH: loop header
LB: loop body
LE: loop exit
PB: predicated region body
PF: predicated region fallthrough
CT: control target
= control target key end

     0   :  { %9 = vsyncpa [#allocation3], 0  ;;  %s905_s0 = inlined_call_operand.hbm [shape: f32[32,128], index: 0, kind: input, shape index: {}]   ;;  %s906_s1 = inlined_call_operand.hbm [shape: f32[128,128], index: 1, kind: input, shape index: {}]   ;;  %s907_s2 = inlined_call_operand.hbm [shape: f32[128,128], index: 2, kind: input, shape index: {}]   ;;  %s908_s3 = inlined_call_operand.vmem [shape: f32[1,128], index: 3, kind: input, shape index: {}]   ;;  %s909_s4 = inlined_call_operand.hbm [shape: f32[32,128], index: 4, kind: output, shape index: {}]  }
   0x1   :  { %10 = vsyncpa [#allocation6], 0 }
   0x2   :  { %11 = vsyncpa [#allocation4], 0  ;;  %s790_s15 = smov [#allocation5]   ;;  %s791_s17 = smov [#allocation2]  }
   0x3   :  { %s29_s16 = sshll.u32 %s790_s15, 4  ;;  %s17_s18 = sshll.u32 %s791_s17, 4  ;;  %s30_s16 = int_to_ptr.vmem [resolvable:$true] %s29_s16  ;;  %s821_s18 = int_to_ptr.vmem [resolvable:$true] %s17_s18 }
   0x4   :  { %s696_s21 = scalar_lea.hbm %s906_s1, 2048 }
   0x5   :  { %p697_p0 = scmp.ne.s32.totalorder %s906_s1, %s696_s21  ;;  %p700_p1 = scmp.lt.u32.totalorder %s696_s21, %s906_s1 }
   0x7   :  { %p702_p2 = pnand %p700_p1, %p697_p0 }
   0x9   :  { %705 = shalt.err (!%p702_p2)
}
   0xa   :  { %s706_s26 = scalar_lea.vmem %s30_s16, 2048  ;;  %p711_p4 = scmp.lt.s32.totalorder %s30_s16, %s30_s16 }
   0xb   :  { %p707_p3 = scmp.ne.s32.totalorder %s30_s16, %s706_s26  ;;  %p712_p5 = scmp.lt.s32.totalorder %s706_s26, %s706_s26 }
   0xd   :  { %p713_p6 = por %p712_p5, %p711_p4 }
   0xf   :  { %p714_p7 = pnand %p713_p6, %p707_p3 }
  0x11   :  { %717 = shalt.err (!%p714_p7)
}
  0x12   :  { %s792_s27 = smov 128   ;;  %s793_s28 = smov 8  }
  0x13   :  { %35 = dma.hbm_to_vmem [thread:$0]  %s906_s1, 2048, %s30_s16, [#allocation6], %s792_s27, %s792_s27, %s793_s28  }
  0x14   :  { %s718_s7 = scalar_lea.hbm %s905_s0, 512 }
  0x15   :  { %p719_p8 = scmp.ne.s32.totalorder %s905_s0, %s718_s7  ;;  %p722_p9 = scmp.lt.u32.totalorder %s718_s7, %s905_s0 }
  0x17   :  { %p724_p10 = pnand %p722_p9, %p719_p8 }
  0x19   :  { %727 = shalt.err (!%p724_p10)
}
  0x1a   :  { %s728_s12 = scalar_lea.vmem %s821_s18, 512  ;;  %p733_p12 = scmp.lt.s32.totalorder %s821_s18, %s821_s18 }
  0x1b   :  { %p729_p11 = scmp.ne.s32.totalorder %s821_s18, %s728_s12  ;;  %p734_p13 = scmp.lt.s32.totalorder %s728_s12, %s728_s12 }
  0x1d   :  { %p735_p0 = por %p734_p13, %p733_p12 }
  0x1f   :  { %p736_p1 = pnand %p735_p0, %p729_p11 }
  0x21   :  { %739 = shalt.err (!%p736_p1)
}
  0x22   :  { %23 = dma.hbm_to_vmem [thread:$0]  %s905_s0, 512, %s821_s18, [#allocation3], %s792_s27, %s792_s27, %s793_s28  }
  0x23   :  { %s794_s14 = smov [#allocation7]   ;;  %s740_s19 = scalar_lea.hbm %s907_s2, 2048 }
  0x24   :  { %s41_s15 = sshll.u32 %s794_s14, 4  ;;  %p741_p2 = scmp.ne.s32.totalorder %s907_s2, %s740_s19  ;;  %s42_s15 = int_to_ptr.vmem [resolvable:$true] %s41_s15 }
  0x25   :  { %p744_p3 = scmp.lt.u32.totalorder %s740_s19, %s907_s2 }
  0x27   :  { %p746_p4 = pnand %p744_p3, %p741_p2 }
  0x29   :  { %749 = shalt.err (!%p746_p4)
}
  0x2a   :  { %s750_s24 = scalar_lea.vmem %s42_s15, 2048  ;;  %p755_p6 = scmp.lt.s32.totalorder %s42_s15, %s42_s15 }
  0x2b   :  { %p751_p5 = scmp.ne.s32.totalorder %s42_s15, %s750_s24  ;;  %p756_p7 = scmp.lt.s32.totalorder %s750_s24, %s750_s24 }
  0x2d   :  { %p757_p8 = por %p756_p7, %p755_p6 }
  0x2f   :  { %p758_p9 = pnand %p757_p8, %p751_p5 }
  0x31   :  { %761 = shalt.err (!%p758_p9)
}
  0x32   :  { %47 = dma.hbm_to_vmem [thread:$0]  %s907_s2, 2048, %s42_s15, [#allocation6], %s792_s27, %s792_s27, %s793_s28  }
  0x33   :  { %784 = dma.done.wait [#allocation3], 512  }
  0x34   :  { %785 = vsyncadd [#allocation3], 4294966784 }
  0x35   :  { %786 = dma.done.wait [#allocation6], 4096  }
  0x36   :  { %787 = vsyncadd [#allocation6], 4294963200  ;;  %v63_v0 = vld [vmem:[#allocation5] sm:$0xff]  ;;  %v64_v1 = vld [vmem:[#allocation5 + $0x8] sm:$0xff]  ;;  %s795_s26 = smov [#allocation8]  }
  0x37   :  { %v65_v2 = vld [vmem:[#allocation5 + $0x10] sm:$0xff]  ;;  %v570_v3 = vpack.c.bf16 %v64_v1, %v63_v0  ;;  %v66_v4 = vld [vmem:[#allocation5 + $0x18] sm:$0xff]  ;;  %v67_v6 = vld [vmem:[#allocation5 + $0x20] sm:$0xff]  ;;  %s382_s29 = sshll.u32 %s795_s26, 4  ;;  %s383_s29 = int_to_ptr.vmem [resolvable:$true] %s382_s29 }
  0x38   :  { %v574_v5 = vpack.c.bf16 %v66_v4, %v65_v2  ;;  %v68_v7 = vld [vmem:[#allocation5 + $0x28] sm:$0xff]  ;;  %v873_v9 = vld [vmem:[#allocation2] sm:$0xff]  ;;  %v69_v10 = vld [vmem:[#allocation5 + $0x30] sm:$0xff]  ;;  %s762_s30 = scalar_lea.vmem %s383_s29, 512  ;;  %p767_p11 = scmp.lt.s32.totalorder %s383_s29, %s383_s29 }
  0x39   :  { %571 = vmatprep.subr.bf16.mxu0 %v570_v3  ;;  %603 = vmatprep.subr.bf16.mxu1 %v570_v3  ;;  %v578_v8 = vpack.c.bf16 %v68_v7, %v67_v6  ;;  %v70_v11 = vld [vmem:[#allocation5 + $0x38] sm:$0xff]  ;;  %v71_v13 = vld [vmem:[#allocation5 + $0x40] sm:$0xff]  ;;  %v72_v14 = vld [vmem:[#allocation5 + $0x48] sm:$0xff]  ;;  %p763_p10 = scmp.ne.s32.totalorder %s383_s29, %s762_s30  ;;  %p768_p12 = scmp.lt.s32.totalorder %s762_s30, %s762_s30 }
  0x3a   :  { %573 = vmatpush3.bf16.msra.mxu0 %v570_v3  ;;  %605 = vmatpush3.bf16.msra.mxu1 %v570_v3  ;;  %v582_v12 = vpack.c.bf16 %v70_v11, %v69_v10  ;;  %v586_v15 = vpack.c.bf16 %v72_v14, %v71_v13  ;;  %v73_v16 = vld [vmem:[#allocation5 + $0x50] sm:$0xff]  ;;  %v74_v17 = vld [vmem:[#allocation5 + $0x58] sm:$0xff]  ;;  %v75_v19 = vld [vmem:[#allocation5 + $0x60] sm:$0xff] }
  0x3b   :  { %575 = vmatprep.subr.bf16.mxu0 %v574_v5  ;;  %607 = vmatprep.subr.bf16.mxu1 %v574_v5  ;;  %v590_v18 = vpack.c.bf16 %v74_v17, %v73_v16  ;;  %v76_v20 = vld [vmem:[#allocation5 + $0x68] sm:$0xff]  ;;  %v77_v22 = vld [vmem:[#allocation5 + $0x70] sm:$0xff]  ;;  %v78_v23 = vld [vmem:[#allocation5 + $0x78] sm:$0xff]  ;;  %p769_p13 = por %p768_p12, %p767_p11 }
  0x3c   :  { %488 = vmatprep.mubr.f32.mxu0 %v873_v9  ;;  %v594_v21 = vpack.c.bf16 %v76_v20, %v75_v19  ;;  %v598_v24 = vpack.c.bf16 %v78_v23, %v77_v22  ;;  %v60_v25 = vld [vmem:[#allocation2 + $0x8] sm:$0xff]  ;;  %v61_v26 = vld [vmem:[#allocation2 + $0x10] sm:$0xff]  ;;  %v62_v27 = vld [vmem:[#allocation2 + $0x18] sm:$0xff] }
  0x3d   :  { %v265_v28 = vld [vmem:[#allocation7] sm:$0xff]  ;;  %v266_v29 = vld [vmem:[#allocation7 + $0x8] sm:$0xff]  ;;  %v267_v30 = vld [vmem:[#allocation7 + $0x10] sm:$0xff]  ;;  %p770_p0 = pnand %p769_p13, %p763_p10 }
  0x3e   :  { %577 = vmatpush3.bf16.msra.mxu0 %v574_v5  ;;  %609 = vmatpush3.bf16.msra.mxu1 %v574_v5  ;;  %v634_v31 = vpack.c.bf16 %v266_v29, %v265_v28  ;;  %v268_v32 = vld [vmem:[#allocation7 + $0x18] sm:$0xff]  ;;  %v269_v34 = vld [vmem:[#allocation7 + $0x20] sm:$0xff]  ;;  %v270_v35 = vld [vmem:[#allocation7 + $0x28] sm:$0xff] }
  0x3f   :  { %579 = vmatprep.subr.bf16.mxu0 %v578_v8  ;;  %611 = vmatprep.subr.bf16.mxu1 %v578_v8  ;;  %v638_v33 = vpack.c.bf16 %v268_v32, %v267_v30  ;;  %v642_v36 = vpack.c.bf16 %v270_v35, %v269_v34  ;;  %v271_v37 = vld [vmem:[#allocation7 + $0x30] sm:$0xff]  ;;  %v272_v38 = vld [vmem:[#allocation7 + $0x38] sm:$0xff]  ;;  %v273_v52 = vld [vmem:[#allocation7 + $0x40] sm:$0xff] }
  0x40   :  { %v646_v39 = vpack.c.bf16 %v272_v38, %v271_v37  ;;  %v274_v53 = vld [vmem:[#allocation7 + $0x48] sm:$0xff]  ;;  %v275_v55 = vld [vmem:[#allocation7 + $0x50] sm:$0xff]  ;;  %v276_v56 = vld [vmem:[#allocation7 + $0x58] sm:$0xff] }
  0x41   :  { %v650_v54 = vpack.c.bf16 %v274_v53, %v273_v52  ;;  %v654_v57 = vpack.c.bf16 %v276_v56, %v275_v55  ;;  %v277_v58 = vld [vmem:[#allocation7 + $0x60] sm:$0xff]  ;;  %v278_v59 = vld [vmem:[#allocation7 + $0x68] sm:$0xff]  ;;  %v279_v61 = vld [vmem:[#allocation7 + $0x70] sm:$0xff] }
  0x42   :  { %581 = vmatpush3.bf16.msra.mxu0 %v578_v8  ;;  %613 = vmatpush3.bf16.msra.mxu1 %v578_v8  ;;  %v658_v60 = vpack.c.bf16 %v278_v59, %v277_v58  ;;  %v280_v62 = vld [vmem:[#allocation7 + $0x78] sm:$0xff]  ;;  %v395_v16 = vld [vmem:[%s908_s3] ss:$0 sm:$0xff] }
  0x43   :  { %583 = vmatprep.subr.bf16.mxu0 %v582_v12  ;;  %615 = vmatprep.subr.bf16.mxu1 %v582_v12  ;;  %v662_v63 = vpack.c.bf16 %v280_v62, %v279_v61 }
  0x46   :  { %585 = vmatpush3.bf16.msra.mxu0 %v582_v12  ;;  %617 = vmatpush3.bf16.msra.mxu1 %v582_v12 }
  0x47   :  { %587 = vmatprep.subr.bf16.mxu0 %v586_v15  ;;  %619 = vmatprep.subr.bf16.mxu1 %v586_v15 }
  0x4a   :  { %589 = vmatpush3.bf16.msra.mxu0 %v586_v15  ;;  %621 = vmatpush3.bf16.msra.mxu1 %v586_v15 }
  0x4b   :  { %591 = vmatprep.subr.bf16.mxu0 %v590_v18  ;;  %623 = vmatprep.subr.bf16.mxu1 %v590_v18 }
  0x4e   :  { %593 = vmatpush3.bf16.msra.mxu0 %v590_v18  ;;  %625 = vmatpush3.bf16.msra.mxu1 %v590_v18 }
  0x4f   :  { %595 = vmatprep.subr.bf16.mxu0 %v594_v21  ;;  %627 = vmatprep.subr.bf16.mxu1 %v594_v21 }
  0x52   :  { %597 = vmatpush3.bf16.msra.mxu0 %v594_v21  ;;  %629 = vmatpush3.bf16.msra.mxu1 %v594_v21 }
  0x53   :  { %599 = vmatprep.subr.bf16.mxu0 %v598_v24  ;;  %631 = vmatprep.subr.bf16.mxu1 %v598_v24 }
  0x56   :  { %601 = vmatpush3.bf16.msra.mxu0 %v598_v24  ;;  %633 = vmatpush3.bf16.msra.mxu1 %v598_v24 }
  0x57   :  { %635 = vmatprep.subr.bf16.mxu0 %v634_v31  ;;  %666 = vmatprep.subr.bf16.mxu1 %v634_v31 }
  0x59   :  { %489 = vmatmul.mubr.f32.vlgmr.msra.gmra.mrb[0].mxu0 %v60_v25 }
  0x5a   :  { %491 = vmatprep.mubr.f32.mxu0 %v61_v26  ;;  %637 = vmatpush3.bf16.msra.mxu0 %v634_v31 }
  0x5b   :  { %639 = vmatprep.subr.bf16.mxu0 %v638_v33 }
  0x5d   :  { %492 = vmatmul.mubr.f32.gmra.mrb[2].mxu0 %v62_v27 }
  0x5e   :  { %641 = vmatpush3.bf16.msra.mxu0 %v638_v33 }
  0x5f   :  { %643 = vmatprep.subr.bf16.mxu0 %v642_v36 }
  0x62   :  { %645 = vmatpush3.bf16.msra.mxu0 %v642_v36 }
  0x63   :  { %647 = vmatprep.subr.bf16.mxu0 %v646_v39 }
  0x66   :  { %649 = vmatpush3.bf16.msra.mxu0 %v646_v39 }
  0x67   :  { %651 = vmatprep.subr.bf16.mxu0 %v650_v54 }
  0x6a   :  { %653 = vmatpush3.bf16.msra.mxu0 %v650_v54 }
  0x6b   :  { %655 = vmatprep.subr.bf16.mxu0 %v654_v57 }
  0x6e   :  { %657 = vmatpush3.bf16.msra.mxu0 %v654_v57 }
  0x6f   :  { %659 = vmatprep.subr.bf16.mxu0 %v658_v60 }
  0x72   :  { %661 = vmatpush3.bf16.msra.mxu0 %v658_v60 }
  0x73   :  { %663 = vmatprep.subr.bf16.mxu0 %v662_v63 }
  0x76   :  { %665 = vmatpush3.bf16.msra.mxu0 %v662_v63 }
 0x12c   :  { %v490_v40 = vpop.f32.mrb[0].mxu0 }
 0x12d   :  { %v876_v41 = vsub.f32 %v60_v25, %v490_v40  ;;  %v145_v42 = vpop.f32.mrb[1].mxu0 }
 0x12e   :  { %v164_v43 = vsub.f32 %v873_v9, %v145_v42 }
 0x12f   :  { %v169_v46 = vmul.f32 %v876_v41, %v876_v41 }
 0x130   :  { %v493_v44 = vpop.f32.mrb[2].mxu0  ;;  %v168_v45 = vmul.f32 %v164_v43, %v164_v43 }
 0x131   :  { %v881_v47 = vsub.f32 %v62_v27, %v493_v44  ;;  %v155_v48 = vpop.f32.mrb[3].mxu0 }
 0x132   :  { %v166_v49 = vsub.f32 %v61_v26, %v155_v48  ;;  %526 = vmatprep.mubr.f32.mxu1 %v168_v45 }
 0x133   :  { %527 = vmatmul.mubr.f32.vlgmr.msra.gmra.mrb[0].mxu1 %v169_v46  ;;  %v171_v51 = vmul.f32 %v881_v47, %v881_v47 }
 0x134   :  { %v170_v50 = vmul.f32 %v166_v49, %v166_v49  ;;  %674 = vmatpush3.bf16.msra.mxu1 %v634_v31 }
 0x135   :  { %667 = vmatprep.subr.bf16.mxu1 %v638_v33 }
 0x136   :  { %529 = vmatprep.mubr.f32.mxu1 %v170_v50 }
 0x137   :  { %530 = vmatmul.mubr.f32.gmra.mrb[2].mxu1 %v171_v51 }
 0x138   :  { %675 = vmatpush3.bf16.msra.mxu1 %v638_v33 }
 0x139   :  { %668 = vmatprep.subr.bf16.mxu1 %v642_v36 }
 0x13c   :  { %676 = vmatpush3.bf16.msra.mxu1 %v642_v36 }
 0x13d   :  { %669 = vmatprep.subr.bf16.mxu1 %v646_v39 }
 0x140   :  { %677 = vmatpush3.bf16.msra.mxu1 %v646_v39 }
 0x141   :  { %670 = vmatprep.subr.bf16.mxu1 %v650_v54 }
 0x144   :  { %678 = vmatpush3.bf16.msra.mxu1 %v650_v54 }
 0x145   :  { %671 = vmatprep.subr.bf16.mxu1 %v654_v57 }
 0x148   :  { %679 = vmatpush3.bf16.msra.mxu1 %v654_v57 }
 0x149   :  { %672 = vmatprep.subr.bf16.mxu1 %v658_v60 }
 0x14c   :  { %680 = vmatpush3.bf16.msra.mxu1 %v658_v60 }
 0x14d   :  { %673 = vmatprep.subr.bf16.mxu1 %v662_v63 }
 0x150   :  { %681 = vmatpush3.bf16.msra.mxu1 %v662_v63 }
 0x206   :  { %v528_v0 = vpop.f32.mrb[0].mxu1 }
 0x207   :  { %v244_v1 = vadd.f32 1e-05, %v528_v0  ;;  %v238_v2 = vpop.f32.mrb[1].mxu1 }
 0x208   :  { %v239_v3 = vadd.f32 1e-05, %v238_v2 }
 0x209   :  { %688 = vrsqrt.f32 %v244_v1 }
 0x20a   :  { %690 = vrsqrt.f32 %v239_v3  ;;  %v531_v4 = vpop.f32.mrb[2].mxu1 }
 0x20b   :  { %v254_v5 = vadd.f32 1e-05, %v531_v4  ;;  %v248_v6 = vpop.f32.mrb[3].mxu1 }
 0x20c   :  { %v249_v7 = vadd.f32 1e-05, %v248_v6 }
 0x20d   :  { %692 = vrsqrt.f32 %v254_v5 }
 0x20e   :  { %694 = vrsqrt.f32 %v249_v7 }
 0x213   :  { %v689_v8 = vpop.eup %688 }
 0x214   :  { %v691_v9 = vpop.eup %690  ;;  %v262_v11 = vmul.f32 %v689_v8, %v876_v41 }
 0x215   :  { %v261_v10 = vmul.f32 %v691_v9, %v164_v43 }
 0x217   :  { %v693_v12 = vpop.eup %692  ;;  %564 = vmatprep.mubr.f32.mxu0 %v261_v10 }
 0x218   :  { %v695_v13 = vpop.eup %694  ;;  %565 = vmatmul.mubr.f32.vlgmr.msra.gmra.mrb[4].mxu0 %v262_v11  ;;  %v264_v15 = vmul.f32 %v693_v12, %v881_v47 }
 0x219   :  { %v263_v14 = vmul.f32 %v695_v13, %v166_v49 }
 0x21b   :  { %567 = vmatprep.mubr.f32.mxu1 %v263_v14 }
 0x21c   :  { %568 = vmatmul.mubr.f32.vlgmr.msra.gmra.mrb[4].mxu1 %v264_v15 }
 0x2eb   :  { %v566_v17 = vpop.f32.mrb[4].mxu0 }
 0x2ec   :  { %v360_v18 = vadd.f32 %v566_v17, %v395_v16  ;;  %v354_v19 = vpop.f32.mrb[5].mxu0 }
 0x2ed   :  { %v355_v20 = vadd.f32 %v395_v16, %v354_v19 }
 0x2ee   :  { %374 = vst [vmem:[#allocation8 + $0x8] sm:$0xff] %v360_v18 }
 0x2ef   :  { %373 = vst [vmem:[#allocation8] sm:$0xff] %v355_v20  ;;  %v569_v21 = vpop.f32.mrb[4].mxu1 }
 0x2f0   :  { %v370_v22 = vadd.f32 %v569_v21, %v395_v16  ;;  %v364_v23 = vpop.f32.mrb[5].mxu1 }
 0x2f1   :  { %v365_v24 = vadd.f32 %v395_v16, %v364_v23 }
 0x2f2   :  { %376 = vst [vmem:[#allocation8 + $0x18] sm:$0xff] %v370_v22 }
 0x2f3   :  { %375 = vst [vmem:[#allocation8 + $0x10] sm:$0xff] %v365_v24 }
 0x2f4   :  { %773 = shalt.err (!%p770_p0)
}
 0x2f5   :  { %s774_s6 = scalar_lea.hbm %s909_s4, 512 }
 0x2f6   :  { %p775_p1 = scmp.ne.s32.totalorder %s909_s4, %s774_s6  ;;  %p778_p2 = scmp.lt.u32.totalorder %s774_s6, %s909_s4 }
 0x2f8   :  { %p780_p3 = pnand %p778_p2, %p775_p1 }
 0x2fa   :  { %783 = shalt.err (!%p780_p3)
}
 0x2fb   :  { %388 = dma.vmem_to_hbm [thread:$0]  %s383_s29, 512, %s909_s4, [#allocation4], %s792_s27, %s792_s27, %s793_s28  }
 0x2fc   :  { %788 = dma.done.wait [#allocation4], 512  }
 0x2fd   :  { %789 = vsyncadd [#allocation4], 4294966784 }
 0x2fe   :  { %392 = vsyncpa [#allocation3], 1 }
 0x2ff   :  { %393 = vsyncpa [#allocation6], 1 }
 0x300   :  { %394 = vsyncpa [#allocation4], 1 }

</bundles_post_ra>
